<compile_context>
chip_gen: v7x
topology: tpu7x:2x2x1
jax: 0.10.0
libtpu: 0.0.40
codegen_flags: <defaults>
</compile_context>

<pallas_src>
import functools

import numpy as np
import jax
import jax.numpy as jnp
from jax import lax
from jax.experimental import pallas as pl
from jax.experimental.pallas import tpu as pltpu


# ----------------------------------------------------------------------------
# Host-side weight fusion for the fused BiLSTM kernel.
# torch gate order per direction is (i, f, g, o); fused column layout is
#   [ i_f | i_b | f_f | f_b | o_f | o_b | g_f | g_b ]   (blocks of size H)
# ----------------------------------------------------------------------------
def _split_gates(w, H):
    return (w[..., 0:H], w[..., H:2 * H], w[..., 2 * H:3 * H], w[..., 3 * H:4 * H])


def _fuse_cols(w_f, w_b, H):
    i_f, f_f, g_f, o_f = _split_gates(w_f, H)
    i_b, f_b, g_b, o_b = _split_gates(w_b, H)
    return jnp.concatenate([i_f, i_b, f_f, f_b, o_f, o_b, g_f, g_b], axis=-1)


def fuse_bilstm_params(wih_f, whh_f, b_f, wih_b, whh_b, b_b, H):
    z_ih = jnp.zeros_like(wih_f)
    z_hh = jnp.zeros_like(whh_f)
    # rows 0:E take the forward input weights, rows E:2E the backward ones.
    wih_big = jnp.concatenate([_fuse_cols(wih_f, z_ih, H),
                               _fuse_cols(z_ih, wih_b, H)], axis=0)   # (2E, 8H)
    # block-diagonal recurrent weights: h_f feeds fwd gate cols, h_b bwd cols.
    whh_big = jnp.concatenate([_fuse_cols(whh_f, z_hh, H),
                               _fuse_cols(z_hh, whh_b, H)], axis=0)   # (2H, 8H)
    b_big = _fuse_cols(b_f, b_b, H)                                    # (1, 8H)
    return wih_big, whh_big, b_big


# ----------------------------------------------------------------------------
# Kernel 1: fused bidirectional LSTM (one recurrence loop, gate order i|f|o||g)
# ----------------------------------------------------------------------------
def _bilstm_kernel(xbig_ref, wih_ref, whh_ref, b_ref, out_ref,
                   xproj_ref, hs_ref, *, T, H):
    H2, H4, H6, H8 = 2 * H, 4 * H, 6 * H, 8 * H

    # Hoisted input projection + bias: one lane-dense MXU matmul, off the
    # serial recurrence chain.  xproj[t] = [x_t @ Wih_f | x_{T-1-t} @ Wih_b] + b
    xproj_ref[...] = (jnp.dot(xbig_ref[...], wih_ref[...],
                              preferred_element_type=jnp.float32)
                      + b_ref[...])
    whh = whh_ref[...]          # hoisted recurrent weights (loaded once)

    def step(t, carry):
        h, c = carry            # h, c: (1, 2H) = [fwd | bwd]
        g_pre = (xproj_ref[pl.ds(t, 1), :]
                 + jnp.dot(h, whh, preferred_element_type=jnp.float32))  # (1, 8H)
        sig = jax.nn.sigmoid(g_pre[:, :H6])      # one contiguous (1, 6H) slab
        g = jnp.tanh(g_pre[:, H6:H8])            # one contiguous (1, 2H) slab
        i = sig[:, 0:H2]
        f = sig[:, H2:H4]
        o = sig[:, H4:H6]
        c = f * c + i * g
        h = o * jnp.tanh(c)
        hs_ref[pl.ds(t, 1), :] = h               # scratch, not out_ref
        return (h, c)

    zero = jnp.zeros((1, H2), jnp.float32)
    lax.fori_loop(0, T, step, (zero, zero), unroll=True)

    # Reassemble: fwd half of scratch row t is time t; bwd half is time T-1-t.
    hs = hs_ref[...]
    r = lax.broadcasted_iota(jnp.int32, (T, T), 0)
    col = lax.broadcasted_iota(jnp.int32, (T, T), 1)
    rev = (r + col == T - 1).astype(jnp.float32)              # time reversal
    hs_rev = jnp.dot(rev, hs, preferred_element_type=jnp.float32)
    lane = lax.broadcasted_iota(jnp.int32, (1, H2), 1)
    fwd_mask = (lane < H).astype(jnp.float32)
    # single full-slab store
    out_ref[...] = hs * fwd_mask + hs_rev * (1.0 - fwd_mask)


def bilstm_pallas(x, wih_f, whh_f, b_f, wih_b, whh_b, b_b, H):
    T, _ = x.shape
    wih_big, whh_big, b_big = fuse_bilstm_params(wih_f, whh_f, b_f,
                                                 wih_b, whh_b, b_b, H)
    # [x | reversed(x)] so one matmul yields both directions' input projections.
    x_big = jnp.concatenate([x, jnp.flip(x, axis=0)], axis=1)   # (T, 2E)
    vmem = pl.BlockSpec(memory_space=pltpu.MemorySpace.VMEM)
    return pl.pallas_call(
        functools.partial(_bilstm_kernel, T=T, H=H),
        out_shape=jax.ShapeDtypeStruct((T, 2 * H), jnp.float32),
        in_specs=[vmem] * 4,
        out_specs=vmem,
        scratch_shapes=[pltpu.VMEM((T, 8 * H), jnp.float32),   # xproj
                        pltpu.VMEM((T, 2 * H), jnp.float32)],  # hidden states
    )(x_big, wih_big, whh_big, b_big)


# ----------------------------------------------------------------------------
# Kernel 2: batched score_actions
#   in-kernel one-hot gather of 6 features per beam row, then
#   tanh(xin @ WbotT + bbot) @ WupT_pad + bup_pad + mask -> log_softmax
# ----------------------------------------------------------------------------
def _score_kernel(idx_ref, lemb_ref, wbot_ref, bbot_ref, wup_ref, bup_ref,
                  mask_ref, out_ref, xin_ref, *, H2, n_feats):
    Bblk = idx_ref.shape[0]
    Tp = lemb_ref.shape[0]
    lemb = lemb_ref[...]                                        # (Tp, 2H)
    pos = lax.broadcasted_iota(jnp.int32, (Bblk, Tp), 1)
    # One-hot MXU gather of the 6 contextual feature vectors into VMEM scratch.
    for k in range(n_feats):
        onehot = (pos == idx_ref[:, k:k + 1]).astype(jnp.float32)   # (B, Tp)
        xin_ref[:, k * H2:(k + 1) * H2] = jnp.dot(
            onehot, lemb, preferred_element_type=jnp.float32)

    h = jnp.tanh(jnp.dot(xin_ref[...], wbot_ref[...],
                         preferred_element_type=jnp.float32) + bbot_ref[...])
    logits = (jnp.dot(h, wup_ref[...], preferred_element_type=jnp.float32)
              + bup_ref[...] + mask_ref[...])                   # (B, Apad)

    # log_softmax with a guard against rows whose legal-action mask is all -inf.
    m = jnp.max(logits, axis=-1, keepdims=True)
    m_safe = jnp.where(m == -jnp.inf, 0.0, m)
    e = jnp.exp(logits - m_safe)
    s = jnp.sum(e, axis=-1, keepdims=True)
    lse = m_safe + jnp.log(s)
    out_ref[...] = jnp.where(s > 0.0, logits - lse, logits)     # lane-dense store


def prepare_score_params(wupT, bup, nactions, apad=128):
    """Pad the action dimension to `apad` lanes once, host-side."""
    hid = wupT.shape[0]
    pad = apad - nactions
    wup_pad = jnp.concatenate([wupT, jnp.zeros((hid, pad), jnp.float32)], axis=1)
    bup_pad = jnp.concatenate([bup, jnp.full((1, pad), -jnp.inf, jnp.float32)],
                              axis=1)
    return wup_pad, bup_pad


def score_actions_pallas(feat_idx, mask, lemb_ext, wbotT, bbot,
                         wup_pad, bup_pad, bblk=8):
    """One call scores the whole beam.

    feat_idx : (B, 6) int32 row indices into lemb_ext (last rows are zero/null)
    mask     : (B, nactions) float32 legality mask (0 / -inf)
    """
    B = feat_idx.shape[0]
    nactions = mask.shape[1]
    Apad = wup_pad.shape[1]
    H2 = lemb_ext.shape[1]
    Bpad = ((B + bblk - 1) // bblk) * bblk
    zrow = lemb_ext.shape[0] - 1                       # a guaranteed zero row

    idx_p = jnp.full((Bpad, 6), zrow, jnp.int32).at[:B].set(
        jnp.asarray(feat_idx, jnp.int32))
    mask_p = jnp.zeros((Bpad, Apad), jnp.float32).at[:B, :nactions].set(
        jnp.asarray(mask, jnp.float32))

    grid = (Bpad // bblk,)
    out = pl.pallas_call(
        functools.partial(_score_kernel, H2=H2, n_feats=6),
        out_shape=jax.ShapeDtypeStruct((Bpad, Apad), jnp.float32),
        grid=grid,
        in_specs=[
            pl.BlockSpec((bblk, 6), lambda b: (b, 0)),            # feature idx
            pl.BlockSpec(lemb_ext.shape, lambda b: (0, 0)),       # lembeddings
            pl.BlockSpec(wbotT.shape, lambda b: (0, 0)),
            pl.BlockSpec(bbot.shape, lambda b: (0, 0)),
            pl.BlockSpec(wup_pad.shape, lambda b: (0, 0)),
            pl.BlockSpec(bup_pad.shape, lambda b: (0, 0)),
            pl.BlockSpec((bblk, Apad), lambda b: (b, 0)),         # mask
        ],
        out_specs=pl.BlockSpec((bblk, Apad), lambda b: (b, 0)),
        scratch_shapes=[pltpu.VMEM((bblk, 6 * H2), jnp.float32)],
        compiler_params=pltpu.CompilerParams(
            dimension_semantics=("parallel",)),   # v7x: 2 TCs split the beam
    )(idx_p, lemb_ext, wbotT, bbot, wup_pad, bup_pad, mask_p)
    return out[:B, :nactions]


# ----------------------------------------------------------------------------
# Pure-JAX references (for correctness check) — use the ORIGINAL torch-layout
# parameters, independent of the kernel-side fusion/reordering.
# ----------------------------------------------------------------------------
def _lstm_dir_ref(x, wih_t, whh_t, b, H, reverse):
    T = x.shape[0]
    order = range(T - 1, -1, -1) if reverse else range(T)
    h = jnp.zeros((1, H), jnp.float32)
    c = jnp.zeros((1, H), jnp.float32)
    outs = [None] * T
    for t in order:
        g = x[t:t + 1] @ wih_t + h @ whh_t + b
        i = jax.nn.sigmoid(g[:, 0 * H:1 * H])
        f = jax.nn.sigmoid(g[:, 1 * H:2 * H])
        gg = jnp.tanh(g[:, 2 * H:3 * H])
        o = jax.nn.sigmoid(g[:, 3 * H:4 * H])
        c = f * c + i * gg
        h = o * jnp.tanh(c)
        outs[t] = h
    return jnp.concatenate(outs, axis=0)


def _score_ref_batch(feat_idx, masks, lemb_ext, wbotT, bbot, wupT, bup):
    rows = []
    for fi, mk in zip(feat_idx, masks):
        xin = jnp.concatenate([lemb_ext[int(i)] for i in fi]).reshape(1, -1)
        h = jnp.tanh(xin @ wbotT + bbot)
        logits = (h @ wupT + bup)[0] + jnp.asarray(mk, jnp.float32)
        rows.append(jax.nn.log_softmax(logits, axis=0))
    return jnp.stack(rows)


# ----------------------------------------------------------------------------
# Host-side helpers mirroring score_actions()'s feature selection / action_mask
# (the DepGraph legality checks are host-only control flow).
# ----------------------------------------------------------------------------
def feature_indices(S1, S2, Buf, T, null_idx):
    def widx(i):
        return i if i >= 0 else T + i   # torch negative-index semantics
    return [
        widx(S1[-1]) if S1 else null_idx,
        widx(S1[-2]) if len(S1) > 1 else null_idx,
        widx(S2[0]) if S2 else null_idx,
        widx(S2[-1]) if S2 else null_idx,
        widx(Buf[0]) if Buf else null_idx,
        widx(Buf[1]) if len(Buf) > 1 else null_idx,
    ]


def action_mask_host(S1, S2, Buf, itoa):
    NEG = float("-inf")
    mv = {"S": 0.0, "N": 0.0, "L": 0.0, "R": 0.0}
    if not S1:
        mv["N"] = mv["L"] = mv["R"] = NEG
    if not Buf:
        mv["S"] = mv["L"] = mv["R"] = NEG
    if S1 and Buf:
        if S1[-1] == -1:
            mv["L"] = NEG
        # TODO(synk): DepGraph is_dag_add / is_cyclic_add legality checks are
        # host-side graph algorithms with no Pallas equivalent (graph is empty
        # in this driver, so they are vacuous here).
    return [mv[a] for a, _ in itoa]


# ----------------------------------------------------------------------------
# Driver
# ----------------------------------------------------------------------------
if __name__ == "__main__":
    # Module hyper-parameters (small, consistent with __init__):
    E = 32          # word_embedding_size
    H = 16          # lstm_hidden_size
    HID = 32        # hidden_size
    dep_labels = ["subj", "obj", "mod"]
    T = 8           # sentence length

    itoa = ([("S", "-"), ("N", "-")]
            + [("L", lbl) for lbl in dep_labels]
            + [("R", lbl) for lbl in dep_labels])
    nactions = len(itoa)   # 8

    key = jax.random.PRNGKey(0)
    keys = jax.random.split(key, 16)

    def uni(k, shape, fan):
        bound = 1.0 / np.sqrt(fan)
        return jax.random.uniform(k, shape, jnp.float32, -bound, bound)

    # LSTM params (torch layout (4H, in), stored pre-transposed (in, 4H),
    # torch gate order i,f,g,o; the kernel-side reorder/fusion happens in
    # fuse_bilstm_params()).
    wih_f = uni(keys[0], (E, 4 * H), H)
    whh_f = uni(keys[1], (H, 4 * H), H)
    b_f = uni(keys[2], (1, 4 * H), H) + uni(keys[3], (1, 4 * H), H)   # b_ih+b_hh
    wih_b = uni(keys[4], (E, 4 * H), H)
    whh_b = uni(keys[5], (H, 4 * H), H)
    b_b = uni(keys[6], (1, 4 * H), H) + uni(keys[7], (1, 4 * H), H)

    # Wbot: Linear(2H*6 -> HID), Wup: Linear(HID -> nactions); pre-transposed.
    wbotT = uni(keys[8], (2 * H * 6, HID), 2 * H * 6)
    bbot = uni(keys[9], (1, HID), 2 * H * 6)
    wupT = uni(keys[10], (HID, nactions), HID)
    bup = uni(keys[11], (1, nactions), HID)

    # Input word embeddings (dropout p=0 -> identity)
    xembeddings = jax.random.normal(keys[12], (T, E), jnp.float32)

    # --- BiLSTM (Pallas, fused + unrolled) ----------------------------------
    lembeddings = bilstm_pallas(xembeddings, wih_f, whh_f, b_f,
                                wih_b, whh_b, b_b, H)
    lembeddings = jax.block_until_ready(lembeddings)

    lemb_ref = jnp.concatenate(
        [_lstm_dir_ref(xembeddings, wih_f, whh_f, b_f, H, reverse=False),
         _lstm_dir_ref(xembeddings, wih_b, whh_b, b_b, H, reverse=True)],
        axis=1)
    ok_lstm = np.allclose(np.asarray(lembeddings), np.asarray(lemb_ref),
                          rtol=1e-4, atol=1e-4)

    # --- batched score_actions over a small beam ----------------------------
    # Extended lembeddings table: rows 0..T-1 real, remaining rows are the
    # null vector (zero); sublane-padded to a multiple of 8.
    Tp_pad = ((T + 1 + 7) // 8) * 8
    lemb_ext = jnp.zeros((Tp_pad, 2 * H), jnp.float32).at[:T].set(lembeddings)
    NULL = T    # index of a zero row == null_vec

    # Beam of 3 configurations reachable from init_config (empty graph):
    #   0: initial          S1=[-1], S2=[],   B=0..T-1   (LEFT_ARC illegal)
    #   1: after SHIFT      S1=[-1,0], S2=[], B=1..T-1   (all legal)
    #   2: after NO_ARC     S1=[],  S2=[-1],  B=0..T-1   (only SHIFT legal)
    configs = [
        ([-1], [], list(range(T))),
        ([-1, 0], [], list(range(1, T))),
        ([], [-1], list(range(T))),
    ]
    feat_idx = np.array(
        [feature_indices(s1, s2, b, T, NULL) for s1, s2, b in configs],
        dtype=np.int32)                                     # (B, 6)
    masks = np.array(
        [action_mask_host(s1, s2, b, itoa) for s1, s2, b in configs],
        dtype=np.float32)                                   # (B, nactions)

    wup_pad, bup_pad = prepare_score_params(wupT, bup, nactions, apad=128)
    ascores = score_actions_pallas(feat_idx, masks, lemb_ext, wbotT, bbot,
                                   wup_pad, bup_pad)
    ascores = jax.block_until_ready(ascores)

    ascores_ref = _score_ref_batch(feat_idx, masks, lemb_ext,
                                   wbotT, bbot, wupT, bup)
    ok_score = np.allclose(np.asarray(ascores), np.asarray(ascores_ref),
                           rtol=1e-4, atol=1e-4)

    assert ok_lstm, "BiLSTM kernel mismatch vs reference"
    assert ok_score, "batched score_actions kernel mismatch vs reference"

    # TODO(synk): the beam-search loop itself (exec_action, DepGraph copies,
    # Python sorting / pruning) is host control flow and stays outside Pallas;
    # per beam step the host builds (feat_idx, mask) and issues ONE batched
    # score_actions_pallas call.

    print("KERNEL_OK")
</pallas_src>

<mosaic_0001>
module attributes {stable_mosaic.version = 11 : i64} {
  func.func @_bilstm_kernel(%arg0: memref<8x64xf32, #tpu.memory_space<vmem>>, %arg1: memref<64x128xf32, #tpu.memory_space<vmem>>, %arg2: memref<32x128xf32, #tpu.memory_space<vmem>>, %arg3: memref<1x128xf32, #tpu.memory_space<vmem>>, %arg4: memref<8x32xf32, #tpu.memory_space<vmem>>, %arg5: memref<8x128xf32, #tpu.memory_space<vmem>>, %arg6: memref<8x32xf32, #tpu.memory_space<vmem>>) attributes {dimension_semantics = [], scalar_prefetch = 0 : i64, scratch_operands = 2 : i64, tpu.core_type = #tpu.core_type<tc>} {
    %c0 = arith.constant 0 : index
    %c0_0 = arith.constant 0 : index
    %0 = vector.load %arg0[%c0, %c0_0] : memref<8x64xf32, #tpu.memory_space<vmem>>, vector<8x64xf32>
    %c0_1 = arith.constant 0 : index
    %c0_2 = arith.constant 0 : index
    %1 = vector.load %arg1[%c0_1, %c0_2] : memref<64x128xf32, #tpu.memory_space<vmem>>, vector<64x128xf32>
    %cst = arith.constant dense<0.000000e+00> : vector<8x128xf32>
    %2 = tpu.matmul %0, %1, %cst {dimension_numbers = #tpu.dot_dimension_numbers<[1], [0], [0], [1], [0, 0, 1, 1], [], []>} : vector<8x64xf32>, vector<64x128xf32>, vector<8x128xf32> -> vector<8x128xf32>
    %c0_3 = arith.constant 0 : index
    %c0_4 = arith.constant 0 : index
    %3 = vector.load %arg3[%c0_3, %c0_4] : memref<1x128xf32, #tpu.memory_space<vmem>>, vector<1x128xf32>
    %4 = vector.broadcast %3 : vector<1x128xf32> to vector<8x128xf32>
    %5 = arith.addf %2, %4 : vector<8x128xf32>
    %c0_5 = arith.constant 0 : index
    %c0_6 = arith.constant 0 : index
    %6 = vector.load %arg5[%c0_5, %c0_6] : memref<8x128xf32, #tpu.memory_space<vmem>>, vector<8x128xf32>
    tpu.vector_store %arg5[%c0_5, %c0_6], %5 {strides = array<i32>} : memref<8x128xf32, #tpu.memory_space<vmem>>, vector<8x128xf32>,
    %c0_7 = arith.constant 0 : index
    %c0_8 = arith.constant 0 : index
    %7 = vector.load %arg2[%c0_7, %c0_8] : memref<32x128xf32, #tpu.memory_space<vmem>>, vector<32x128xf32>
    %cst_9 = arith.constant 0.000000e+00 : f32
    %8 = vector.broadcast %cst_9 : f32 to vector<1x32xf32>
    %c0_i32 = arith.constant 0 : i32
    %9 = arith.index_cast %c0_i32 : i32 to index
    %c0_10 = arith.constant 0 : index
    %10 = vector.load %arg5[%9, %c0_10] : memref<8x128xf32, #tpu.memory_space<vmem>>, vector<1x128xf32>
    %cst_11 = arith.constant dense<0.000000e+00> : vector<1x128xf32>
    %11 = tpu.matmul %8, %7, %cst_11 {dimension_numbers = #tpu.dot_dimension_numbers<[1], [0], [0], [1], [0, 0, 1, 1], [], []>} : vector<1x32xf32>, vector<32x128xf32>, vector<1x128xf32> -> vector<1x128xf32>
    %12 = arith.addf %10, %11 : vector<1x128xf32>
    %13 = vector.extract_strided_slice %12 {offsets = [0, 0], sizes = [1, 96], strides = [1, 1]} : vector<1x128xf32> to vector<1x96xf32>
    %14 = arith.negf %13 : vector<1x96xf32>
    %15 = math.exp %14 : vector<1x96xf32>
    %cst_12 = arith.constant 1.000000e+00 : f32
    %16 = vector.broadcast %cst_12 : f32 to vector<1x96xf32>
    %17 = arith.addf %16, %15 : vector<1x96xf32>
    %18 = arith.divf %16, %17 : vector<1x96xf32>
    %19 = vector.extract_strided_slice %12 {offsets = [0, 96], sizes = [1, 32], strides = [1, 1]} : vector<1x128xf32> to vector<1x32xf32>
    %20 = math.tanh %19 : vector<1x32xf32>
    %21 = vector.extract_strided_slice %18 {offsets = [0, 0], sizes = [1, 32], strides = [1, 1]} : vector<1x96xf32> to vector<1x32xf32>
    %22 = vector.extract_strided_slice %18 {offsets = [0, 32], sizes = [1, 32], strides = [1, 1]} : vector<1x96xf32> to vector<1x32xf32>
    %23 = vector.extract_strided_slice %18 {offsets = [0, 64], sizes = [1, 32], strides = [1, 1]} : vector<1x96xf32> to vector<1x32xf32>
    %24 = arith.mulf %22, %8 : vector<1x32xf32>
    %25 = arith.mulf %21, %20 : vector<1x32xf32>
    %26 = arith.addf %24, %25 : vector<1x32xf32>
    %27 = math.tanh %26 : vector<1x32xf32>
    %28 = arith.mulf %23, %27 : vector<1x32xf32>
    %29 = arith.index_cast %c0_i32 : i32 to index
    %c0_13 = arith.constant 0 : index
    %30 = vector.load %arg6[%29, %c0_13] : memref<8x32xf32, #tpu.memory_space<vmem>>, vector<1x32xf32>
    tpu.vector_store %arg6[%29, %c0_13], %28 {strides = array<i32>} : memref<8x32xf32, #tpu.memory_space<vmem>>, vector<1x32xf32>,
    %c1_i32 = arith.constant 1 : i32
    %31 = arith.index_cast %c1_i32 : i32 to index
    %c0_14 = arith.constant 0 : index
    %32 = vector.load %arg5[%31, %c0_14] : memref<8x128xf32, #tpu.memory_space<vmem>>, vector<1x128xf32>
    %cst_15 = arith.constant dense<0.000000e+00> : vector<1x128xf32>
    %33 = tpu.matmul %28, %7, %cst_15 {dimension_numbers = #tpu.dot_dimension_numbers<[1], [0], [0], [1], [0, 0, 1, 1], [], []>} : vector<1x32xf32>, vector<32x128xf32>, vector<1x128xf32> -> vector<1x128xf32>
    %34 = arith.addf %32, %33 : vector<1x128xf32>
    %35 = vector.extract_strided_slice %34 {offsets = [0, 0], sizes = [1, 96], strides = [1, 1]} : vector<1x128xf32> to vector<1x96xf32>
    %36 = arith.negf %35 : vector<1x96xf32>
    %37 = math.exp %36 : vector<1x96xf32>
    %cst_16 = arith.constant 1.000000e+00 : f32
    %38 = vector.broadcast %cst_16 : f32 to vector<1x96xf32>
    %39 = arith.addf %38, %37 : vector<1x96xf32>
    %40 = arith.divf %38, %39 : vector<1x96xf32>
    %41 = vector.extract_strided_slice %34 {offsets = [0, 96], sizes = [1, 32], strides = [1, 1]} : vector<1x128xf32> to vector<1x32xf32>
    %42 = math.tanh %41 : vector<1x32xf32>
    %43 = vector.extract_strided_slice %40 {offsets = [0, 0], sizes = [1, 32], strides = [1, 1]} : vector<1x96xf32> to vector<1x32xf32>
    %44 = vector.extract_strided_slice %40 {offsets = [0, 32], sizes = [1, 32], strides = [1, 1]} : vector<1x96xf32> to vector<1x32xf32>
    %45 = vector.extract_strided_slice %40 {offsets = [0, 64], sizes = [1, 32], strides = [1, 1]} : vector<1x96xf32> to vector<1x32xf32>
    %46 = arith.mulf %44, %26 : vector<1x32xf32>
    %47 = arith.mulf %43, %42 : vector<1x32xf32>
    %48 = arith.addf %46, %47 : vector<1x32xf32>
    %49 = math.tanh %48 : vector<1x32xf32>
    %50 = arith.mulf %45, %49 : vector<1x32xf32>
    %51 = arith.index_cast %c1_i32 : i32 to index
    %c0_17 = arith.constant 0 : index
    %52 = vector.load %arg6[%51, %c0_17] : memref<8x32xf32, #tpu.memory_space<vmem>>, vector<1x32xf32>
    tpu.vector_store %arg6[%51, %c0_17], %50 {strides = array<i32>} : memref<8x32xf32, #tpu.memory_space<vmem>>, vector<1x32xf32>,
    %c2_i32 = arith.constant 2 : i32
    %53 = arith.index_cast %c2_i32 : i32 to index
    %c0_18 = arith.constant 0 : index
    %54 = vector.load %arg5[%53, %c0_18] : memref<8x128xf32, #tpu.memory_space<vmem>>, vector<1x128xf32>
    %cst_19 = arith.constant dense<0.000000e+00> : vector<1x128xf32>
    %55 = tpu.matmul %50, %7, %cst_19 {dimension_numbers = #tpu.dot_dimension_numbers<[1], [0], [0], [1], [0, 0, 1, 1], [], []>} : vector<1x32xf32>, vector<32x128xf32>, vector<1x128xf32> -> vector<1x128xf32>
    %56 = arith.addf %54, %55 : vector<1x128xf32>
    %57 = vector.extract_strided_slice %56 {offsets = [0, 0], sizes = [1, 96], strides = [1, 1]} : vector<1x128xf32> to vector<1x96xf32>
    %58 = arith.negf %57 : vector<1x96xf32>
    %59 = math.exp %58 : vector<1x96xf32>
    %cst_20 = arith.constant 1.000000e+00 : f32
    %60 = vector.broadcast %cst_20 : f32 to vector<1x96xf32>
    %61 = arith.addf %60, %59 : vector<1x96xf32>
    %62 = arith.divf %60, %61 : vector<1x96xf32>
    %63 = vector.extract_strided_slice %56 {offsets = [0, 96], sizes = [1, 32], strides = [1, 1]} : vector<1x128xf32> to vector<1x32xf32>
    %64 = math.tanh %63 : vector<1x32xf32>
    %65 = vector.extract_strided_slice %62 {offsets = [0, 0], sizes = [1, 32], strides = [1, 1]} : vector<1x96xf32> to vector<1x32xf32>
    %66 = vector.extract_strided_slice %62 {offsets = [0, 32], sizes = [1, 32], strides = [1, 1]} : vector<1x96xf32> to vector<1x32xf32>
    %67 = vector.extract_strided_slice %62 {offsets = [0, 64], sizes = [1, 32], strides = [1, 1]} : vector<1x96xf32> to vector<1x32xf32>
    %68 = arith.mulf %66, %48 : vector<1x32xf32>
    %69 = arith.mulf %65, %64 : vector<1x32xf32>
    %70 = arith.addf %68, %69 : vector<1x32xf32>
    %71 = math.tanh %70 : vector<1x32xf32>
    %72 = arith.mulf %67, %71 : vector<1x32xf32>
    %73 = arith.index_cast %c2_i32 : i32 to index
    %c0_21 = arith.constant 0 : index
    %74 = vector.load %arg6[%73, %c0_21] : memref<8x32xf32, #tpu.memory_space<vmem>>, vector<1x32xf32>
    tpu.vector_store %arg6[%73, %c0_21], %72 {strides = array<i32>} : memref<8x32xf32, #tpu.memory_space<vmem>>, vector<1x32xf32>,
    %c3_i32 = arith.constant 3 : i32
    %75 = arith.index_cast %c3_i32 : i32 to index
    %c0_22 = arith.constant 0 : index
    %76 = vector.load %arg5[%75, %c0_22] : memref<8x128xf32, #tpu.memory_space<vmem>>, vector<1x128xf32>
    %cst_23 = arith.constant dense<0.000000e+00> : vector<1x128xf32>
    %77 = tpu.matmul %72, %7, %cst_23 {dimension_numbers = #tpu.dot_dimension_numbers<[1], [0], [0], [1], [0, 0, 1, 1], [], []>} : vector<1x32xf32>, vector<32x128xf32>, vector<1x128xf32> -> vector<1x128xf32>
    %78 = arith.addf %76, %77 : vector<1x128xf32>
    %79 = vector.extract_strided_slice %78 {offsets = [0, 0], sizes = [1, 96], strides = [1, 1]} : vector<1x128xf32> to vector<1x96xf32>
    %80 = arith.negf %79 : vector<1x96xf32>
    %81 = math.exp %80 : vector<1x96xf32>
    %cst_24 = arith.constant 1.000000e+00 : f32
    %82 = vector.broadcast %cst_24 : f32 to vector<1x96xf32>
    %83 = arith.addf %82, %81 : vector<1x96xf32>
    %84 = arith.divf %82, %83 : vector<1x96xf32>
    %85 = vector.extract_strided_slice %78 {offsets = [0, 96], sizes = [1, 32], strides = [1, 1]} : vector<1x128xf32> to vector<1x32xf32>
    %86 = math.tanh %85 : vector<1x32xf32>
    %87 = vector.extract_strided_slice %84 {offsets = [0, 0], sizes = [1, 32], strides = [1, 1]} : vector<1x96xf32> to vector<1x32xf32>
    %88 = vector.extract_strided_slice %84 {offsets = [0, 32], sizes = [1, 32], strides = [1, 1]} : vector<1x96xf32> to vector<1x32xf32>
    %89 = vector.extract_strided_slice %84 {offsets = [0, 64], sizes = [1, 32], strides = [1, 1]} : vector<1x96xf32> to vector<1x32xf32>
    %90 = arith.mulf %88, %70 : vector<1x32xf32>
    %91 = arith.mulf %87, %86 : vector<1x32xf32>
    %92 = arith.addf %90, %91 : vector<1x32xf32>
    %93 = math.tanh %92 : vector<1x32xf32>
    %94 = arith.mulf %89, %93 : vector<1x32xf32>
    %95 = arith.index_cast %c3_i32 : i32 to index
    %c0_25 = arith.constant 0 : index
    %96 = vector.load %arg6[%95, %c0_25] : memref<8x32xf32, #tpu.memory_space<vmem>>, vector<1x32xf32>
    tpu.vector_store %arg6[%95, %c0_25], %94 {strides = array<i32>} : memref<8x32xf32, #tpu.memory_space<vmem>>, vector<1x32xf32>,
    %c4_i32 = arith.constant 4 : i32
    %97 = arith.index_cast %c4_i32 : i32 to index
    %c0_26 = arith.constant 0 : index
    %98 = vector.load %arg5[%97, %c0_26] : memref<8x128xf32, #tpu.memory_space<vmem>>, vector<1x128xf32>
    %cst_27 = arith.constant dense<0.000000e+00> : vector<1x128xf32>
    %99 = tpu.matmul %94, %7, %cst_27 {dimension_numbers = #tpu.dot_dimension_numbers<[1], [0], [0], [1], [0, 0, 1, 1], [], []>} : vector<1x32xf32>, vector<32x128xf32>, vector<1x128xf32> -> vector<1x128xf32>
    %100 = arith.addf %98, %99 : vector<1x128xf32>
    %101 = vector.extract_strided_slice %100 {offsets = [0, 0], sizes = [1, 96], strides = [1, 1]} : vector<1x128xf32> to vector<1x96xf32>
    %102 = arith.negf %101 : vector<1x96xf32>
    %103 = math.exp %102 : vector<1x96xf32>
    %cst_28 = arith.constant 1.000000e+00 : f32
    %104 = vector.broadcast %cst_28 : f32 to vector<1x96xf32>
    %105 = arith.addf %104, %103 : vector<1x96xf32>
    %106 = arith.divf %104, %105 : vector<1x96xf32>
    %107 = vector.extract_strided_slice %100 {offsets = [0, 96], sizes = [1, 32], strides = [1, 1]} : vector<1x128xf32> to vector<1x32xf32>
    %108 = math.tanh %107 : vector<1x32xf32>
    %109 = vector.extract_strided_slice %106 {offsets = [0, 0], sizes = [1, 32], strides = [1, 1]} : vector<1x96xf32> to vector<1x32xf32>
    %110 = vector.extract_strided_slice %106 {offsets = [0, 32], sizes = [1, 32], strides = [1, 1]} : vector<1x96xf32> to vector<1x32xf32>
    %111 = vector.extract_strided_slice %106 {offsets = [0, 64], sizes = [1, 32], strides = [1, 1]} : vector<1x96xf32> to vector<1x32xf32>
    %112 = arith.mulf %110, %92 : vector<1x32xf32>
    %113 = arith.mulf %109, %108 : vector<1x32xf32>
    %114 = arith.addf %112, %113 : vector<1x32xf32>
    %115 = math.tanh %114 : vector<1x32xf32>
    %116 = arith.mulf %111, %115 : vector<1x32xf32>
    %117 = arith.index_cast %c4_i32 : i32 to index
    %c0_29 = arith.constant 0 : index
    %118 = vector.load %arg6[%117, %c0_29] : memref<8x32xf32, #tpu.memory_space<vmem>>, vector<1x32xf32>
    tpu.vector_store %arg6[%117, %c0_29], %116 {strides = array<i32>} : memref<8x32xf32, #tpu.memory_space<vmem>>, vector<1x32xf32>,
    %c5_i32 = arith.constant 5 : i32
    %119 = arith.index_cast %c5_i32 : i32 to index
    %c0_30 = arith.constant 0 : index
    %120 = vector.load %arg5[%119, %c0_30] : memref<8x128xf32, #tpu.memory_space<vmem>>, vector<1x128xf32>
    %cst_31 = arith.constant dense<0.000000e+00> : vector<1x128xf32>
    %121 = tpu.matmul %116, %7, %cst_31 {dimension_numbers = #tpu.dot_dimension_numbers<[1], [0], [0], [1], [0, 0, 1, 1], [], []>} : vector<1x32xf32>, vector<32x128xf32>, vector<1x128xf32> -> vector<1x128xf32>
    %122 = arith.addf %120, %121 : vector<1x128xf32>
    %123 = vector.extract_strided_slice %122 {offsets = [0, 0], sizes = [1, 96], strides = [1, 1]} : vector<1x128xf32> to vector<1x96xf32>
    %124 = arith.negf %123 : vector<1x96xf32>
    %125 = math.exp %124 : vector<1x96xf32>
    %cst_32 = arith.constant 1.000000e+00 : f32
    %126 = vector.broadcast %cst_32 : f32 to vector<1x96xf32>
    %127 = arith.addf %126, %125 : vector<1x96xf32>
    %128 = arith.divf %126, %127 : vector<1x96xf32>
    %129 = vector.extract_strided_slice %122 {offsets = [0, 96], sizes = [1, 32], strides = [1, 1]} : vector<1x128xf32> to vector<1x32xf32>
    %130 = math.tanh %129 : vector<1x32xf32>
    %131 = vector.extract_strided_slice %128 {offsets = [0, 0], sizes = [1, 32], strides = [1, 1]} : vector<1x96xf32> to vector<1x32xf32>
    %132 = vector.extract_strided_slice %128 {offsets = [0, 32], sizes = [1, 32], strides = [1, 1]} : vector<1x96xf32> to vector<1x32xf32>
    %133 = vector.extract_strided_slice %128 {offsets = [0, 64], sizes = [1, 32], strides = [1, 1]} : vector<1x96xf32> to vector<1x32xf32>
    %134 = arith.mulf %132, %114 : vector<1x32xf32>
    %135 = arith.mulf %131, %130 : vector<1x32xf32>
    %136 = arith.addf %134, %135 : vector<1x32xf32>
    %137 = math.tanh %136 : vector<1x32xf32>
    %138 = arith.mulf %133, %137 : vector<1x32xf32>
    %139 = arith.index_cast %c5_i32 : i32 to index
    %c0_33 = arith.constant 0 : index
    %140 = vector.load %arg6[%139, %c0_33] : memref<8x32xf32, #tpu.memory_space<vmem>>, vector<1x32xf32>
    tpu.vector_store %arg6[%139, %c0_33], %138 {strides = array<i32>} : memref<8x32xf32, #tpu.memory_space<vmem>>, vector<1x32xf32>,
    %c6_i32 = arith.constant 6 : i32
    %141 = arith.index_cast %c6_i32 : i32 to index
    %c0_34 = arith.constant 0 : index
    %142 = vector.load %arg5[%141, %c0_34] : memref<8x128xf32, #tpu.memory_space<vmem>>, vector<1x128xf32>
    %cst_35 = arith.constant dense<0.000000e+00> : vector<1x128xf32>
    %143 = tpu.matmul %138, %7, %cst_35 {dimension_numbers = #tpu.dot_dimension_numbers<[1], [0], [0], [1], [0, 0, 1, 1], [], []>} : vector<1x32xf32>, vector<32x128xf32>, vector<1x128xf32> -> vector<1x128xf32>
    %144 = arith.addf %142, %143 : vector<1x128xf32>
    %145 = vector.extract_strided_slice %144 {offsets = [0, 0], sizes = [1, 96], strides = [1, 1]} : vector<1x128xf32> to vector<1x96xf32>
    %146 = arith.negf %145 : vector<1x96xf32>
    %147 = math.exp %146 : vector<1x96xf32>
    %cst_36 = arith.constant 1.000000e+00 : f32
    %148 = vector.broadcast %cst_36 : f32 to vector<1x96xf32>
    %149 = arith.addf %148, %147 : vector<1x96xf32>
    %150 = arith.divf %148, %149 : vector<1x96xf32>
    %151 = vector.extract_strided_slice %144 {offsets = [0, 96], sizes = [1, 32], strides = [1, 1]} : vector<1x128xf32> to vector<1x32xf32>
    %152 = math.tanh %151 : vector<1x32xf32>
    %153 = vector.extract_strided_slice %150 {offsets = [0, 0], sizes = [1, 32], strides = [1, 1]} : vector<1x96xf32> to vector<1x32xf32>
    %154 = vector.extract_strided_slice %150 {offsets = [0, 32], sizes = [1, 32], strides = [1, 1]} : vector<1x96xf32> to vector<1x32xf32>
    %155 = vector.extract_strided_slice %150 {offsets = [0, 64], sizes = [1, 32], strides = [1, 1]} : vector<1x96xf32> to vector<1x32xf32>
    %156 = arith.mulf %154, %136 : vector<1x32xf32>
    %157 = arith.mulf %153, %152 : vector<1x32xf32>
    %158 = arith.addf %156, %157 : vector<1x32xf32>
    %159 = math.tanh %158 : vector<1x32xf32>
    %160 = arith.mulf %155, %159 : vector<1x32xf32>
    %161 = arith.index_cast %c6_i32 : i32 to index
    %c0_37 = arith.constant 0 : index
    %162 = vector.load %arg6[%161, %c0_37] : memref<8x32xf32, #tpu.memory_space<vmem>>, vector<1x32xf32>
    tpu.vector_store %arg6[%161, %c0_37], %160 {strides = array<i32>} : memref<8x32xf32, #tpu.memory_space<vmem>>, vector<1x32xf32>,
    %c7_i32 = arith.constant 7 : i32
    %163 = arith.index_cast %c7_i32 : i32 to index
    %c0_38 = arith.constant 0 : index
    %164 = vector.load %arg5[%163, %c0_38] : memref<8x128xf32, #tpu.memory_space<vmem>>, vector<1x128xf32>
    %cst_39 = arith.constant dense<0.000000e+00> : vector<1x128xf32>
    %165 = tpu.matmul %160, %7, %cst_39 {dimension_numbers = #tpu.dot_dimension_numbers<[1], [0], [0], [1], [0, 0, 1, 1], [], []>} : vector<1x32xf32>, vector<32x128xf32>, vector<1x128xf32> -> vector<1x128xf32>
    %166 = arith.addf %164, %165 : vector<1x128xf32>
    %167 = vector.extract_strided_slice %166 {offsets = [0, 0], sizes = [1, 96], strides = [1, 1]} : vector<1x128xf32> to vector<1x96xf32>
    %168 = arith.negf %167 : vector<1x96xf32>
    %169 = math.exp %168 : vector<1x96xf32>
    %cst_40 = arith.constant 1.000000e+00 : f32
    %170 = vector.broadcast %cst_40 : f32 to vector<1x96xf32>
    %171 = arith.addf %170, %169 : vector<1x96xf32>
    %172 = arith.divf %170, %171 : vector<1x96xf32>
    %173 = vector.extract_strided_slice %166 {offsets = [0, 96], sizes = [1, 32], strides = [1, 1]} : vector<1x128xf32> to vector<1x32xf32>
    %174 = math.tanh %173 : vector<1x32xf32>
    %175 = vector.extract_strided_slice %172 {offsets = [0, 0], sizes = [1, 32], strides = [1, 1]} : vector<1x96xf32> to vector<1x32xf32>
    %176 = vector.extract_strided_slice %172 {offsets = [0, 32], sizes = [1, 32], strides = [1, 1]} : vector<1x96xf32> to vector<1x32xf32>
    %177 = vector.extract_strided_slice %172 {offsets = [0, 64], sizes = [1, 32], strides = [1, 1]} : vector<1x96xf32> to vector<1x32xf32>
    %178 = arith.mulf %176, %158 : vector<1x32xf32>
    %179 = arith.mulf %175, %174 : vector<1x32xf32>
    %180 = arith.addf %178, %179 : vector<1x32xf32>
    %181 = math.tanh %180 : vector<1x32xf32>
    %182 = arith.mulf %177, %181 : vector<1x32xf32>
    %183 = arith.index_cast %c7_i32 : i32 to index
    %c0_41 = arith.constant 0 : index
    %184 = vector.load %arg6[%183, %c0_41] : memref<8x32xf32, #tpu.memory_space<vmem>>, vector<1x32xf32>
    tpu.vector_store %arg6[%183, %c0_41], %182 {strides = array<i32>} : memref<8x32xf32, #tpu.memory_space<vmem>>, vector<1x32xf32>,
    %c8_i32 = arith.constant 8 : i32
    %c0_42 = arith.constant 0 : index
    %c0_43 = arith.constant 0 : index
    %185 = vector.load %arg6[%c0_42, %c0_43] : memref<8x32xf32, #tpu.memory_space<vmem>>, vector<8x32xf32>
    %186 = tpu.iota {dimensions = array<i32: 0>} : vector<8x8xi32>
    %187 = tpu.iota {dimensions = array<i32: 1>} : vector<8x8xi32>
    %188 = arith.addi %186, %187 : vector<8x8xi32>
    %c7_i32_44 = arith.constant 7 : i32
    %189 = vector.broadcast %c7_i32_44 : i32 to vector<8x8xi32>
    %190 = arith.cmpi eq, %188, %189 : vector<8x8xi32>
    %191 = arith.extui %190 : vector<8x8xi1> to vector<8x8xi32>
    %192 = arith.sitofp %191 : vector<8x8xi32> to vector<8x8xf32>
    %cst_45 = arith.constant dense<0.000000e+00> : vector<8x32xf32>
    %193 = tpu.matmul %192, %185, %cst_45 {dimension_numbers = #tpu.dot_dimension_numbers<[1], [0], [0], [1], [0, 0, 1, 1], [], []>} : vector<8x8xf32>, vector<8x32xf32>, vector<8x32xf32> -> vector<8x32xf32>
    %194 = tpu.iota {dimensions = array<i32: 1>} : vector<1x32xi32>
    %c16_i32 = arith.constant 16 : i32
    %195 = vector.broadcast %c16_i32 : i32 to vector<1x32xi32>
    %196 = arith.cmpi slt, %194, %195 : vector<1x32xi32>
    %197 = arith.extui %196 : vector<1x32xi1> to vector<1x32xi32>
    %198 = arith.sitofp %197 : vector<1x32xi32> to vector<1x32xf32>
    %199 = vector.broadcast %198 : vector<1x32xf32> to vector<8x32xf32>
    %200 = arith.mulf %185, %199 : vector<8x32xf32>
    %cst_46 = arith.constant 1.000000e+00 : f32
    %201 = vector.broadcast %cst_46 : f32 to vector<1x32xf32>
    %202 = arith.subf %201, %198 : vector<1x32xf32>
    %203 = vector.broadcast %202 : vector<1x32xf32> to vector<8x32xf32>
    %204 = arith.mulf %193, %203 : vector<8x32xf32>
    %205 = arith.addf %200, %204 : vector<8x32xf32>
    %c0_47 = arith.constant 0 : index
    %c0_48 = arith.constant 0 : index
    %206 = vector.load %arg4[%c0_47, %c0_48] : memref<8x32xf32, #tpu.memory_space<vmem>>, vector<8x32xf32>
    tpu.vector_store %arg4[%c0_47, %c0_48], %205 {strides = array<i32>} : memref<8x32xf32, #tpu.memory_space<vmem>>, vector<8x32xf32>,
    return
  }
}

</mosaic_0001>

<bundles_post_ra>
// kernel: tpu_custom_call.1
= control target key start
LH: loop header
LB: loop body
LE: loop exit
PB: predicated region body
PF: predicated region fallthrough
CT: control target
= control target key end

     0   :  { %9 = vsyncpa [#allocation5], 0  ;;  %s1703_s0 = inlined_call_operand.hbm [shape: f32[8,64], index: 0, kind: input, shape index: {}]   ;;  %s1704_s1 = inlined_call_operand.hbm [shape: f32[64,128], index: 1, kind: input, shape index: {}]   ;;  %s1705_s2 = inlined_call_operand.hbm [shape: f32[32,128], index: 2, kind: input, shape index: {}]   ;;  %s1706_s3 = inlined_call_operand.vmem [shape: f32[1,128], index: 3, kind: input, shape index: {}]   ;;  %s1707_s4 = inlined_call_operand.hbm [shape: f32[8,32], index: 4, kind: output, shape index: {}]  }
   0x1   :  { %10 = vsyncpa [#allocation8], 0 }
   0x2   :  { %11 = vsyncpa [#allocation6], 0  ;;  %s1498_s15 = smov [#allocation7]   ;;  %s1404_s19 = scalar_lea.hbm %s1704_s1, 1024 }
   0x3   :  { %s27_s16 = sshll.u32 %s1498_s15, 4  ;;  %p1405_p0 = scmp.ne.s32.totalorder %s1704_s1, %s1404_s19  ;;  %s28_s16 = int_to_ptr.vmem [resolvable:$true] %s27_s16 }
   0x4   :  { %p1408_p1 = scmp.lt.u32.totalorder %s1404_s19, %s1704_s1 }
   0x6   :  { %p1410_p2 = pnand %p1408_p1, %p1405_p0 }
   0x8   :  { %1413 = shalt.err (!%p1410_p2)
}
   0x9   :  { %s1414_s24 = scalar_lea.vmem %s28_s16, 1024  ;;  %p1419_p4 = scmp.lt.s32.totalorder %s28_s16, %s28_s16 }
   0xa   :  { %p1415_p3 = scmp.ne.s32.totalorder %s28_s16, %s1414_s24  ;;  %p1420_p5 = scmp.lt.s32.totalorder %s1414_s24, %s1414_s24 }
   0xc   :  { %p1421_p6 = por %p1420_p5, %p1419_p4 }
   0xe   :  { %p1422_p7 = pnand %p1421_p6, %p1415_p3 }
  0x10   :  { %1425 = shalt.err (!%p1422_p7)
}
  0x11   :  { %s1499_s25 = smov 128   ;;  %s1500_s26 = smov 8  }
  0x12   :  { %33 = dma.hbm_to_vmem [thread:$0]  %s1704_s1, 1024, %s28_s16, [#allocation8], %s1499_s25, %s1499_s25, %s1500_s26  }
  0x13   :  { %s1501_s29 = smov [#allocation4]   ;;  %s1502_s5 = smov [#allocation9]  }
  0x14   :  { %s18_s30 = sshll.u32 %s1501_s29, 4  ;;  %s39_s6 = sshll.u32 %s1502_s5, 4  ;;  %s19_s30 = int_to_ptr.vmem [resolvable:$true] %s18_s30  ;;  %s40_s6 = int_to_ptr.vmem [resolvable:$true] %s39_s6 }
  0x15   :  { %s1426_s9 = scalar_lea.hbm %s1703_s0, 128 }
  0x16   :  { %p1427_p8 = scmp.ne.s32.totalorder %s1703_s0, %s1426_s9  ;;  %p1430_p9 = scmp.lt.u32.totalorder %s1426_s9, %s1703_s0 }
  0x18   :  { %p1432_p10 = pnand %p1430_p9, %p1427_p8 }
  0x1a   :  { %1435 = shalt.err (!%p1432_p10)
}
  0x1b   :  { %s1436_s1 = scalar_lea.vmem %s19_s30, 128  ;;  %p1441_p12 = scmp.lt.s32.totalorder %s19_s30, %s19_s30 }
  0x1c   :  { %p1437_p11 = scmp.ne.s32.totalorder %s19_s30, %s1436_s1  ;;  %p1442_p13 = scmp.lt.s32.totalorder %s1436_s1, %s1436_s1 }
  0x1e   :  { %p1443_p0 = por %p1442_p13, %p1441_p12 }
  0x20   :  { %p1444_p1 = pnand %p1443_p0, %p1437_p11 }
  0x22   :  { %1447 = shalt.err (!%p1444_p1)
}
  0x23   :  { %21 = dma.hbm_to_vmem [thread:$0]  %s1703_s0, 128, %s19_s30, [#allocation5]  }
  0x24   :  { %s1448_s18 = scalar_lea.hbm %s1705_s2, 512 }
  0x25   :  { %p1449_p2 = scmp.ne.s32.totalorder %s1705_s2, %s1448_s18  ;;  %p1452_p3 = scmp.lt.u32.totalorder %s1448_s18, %s1705_s2 }
  0x27   :  { %p1454_p4 = pnand %p1452_p3, %p1449_p2 }
  0x29   :  { %1457 = shalt.err (!%p1454_p4)
}
  0x2a   :  { %s1458_s23 = scalar_lea.vmem %s40_s6, 512  ;;  %p1463_p6 = scmp.lt.s32.totalorder %s40_s6, %s40_s6 }
  0x2b   :  { %p1459_p5 = scmp.ne.s32.totalorder %s40_s6, %s1458_s23  ;;  %p1464_p7 = scmp.lt.s32.totalorder %s1458_s23, %s1458_s23 }
  0x2d   :  { %p1465_p8 = por %p1464_p7, %p1463_p6 }
  0x2f   :  { %p1466_p9 = pnand %p1465_p8, %p1459_p5 }
  0x31   :  { %1469 = shalt.err (!%p1466_p9)
}
  0x32   :  { %45 = dma.hbm_to_vmem [thread:$0]  %s1705_s2, 512, %s40_s6, [#allocation8], %s1499_s25, %s1499_s25, %s1500_s26  }
  0x33   :  { %1492 = dma.done.wait [#allocation5], 128  }
  0x34   :  { %1493 = vsyncadd [#allocation5], 4294967168 }
  0x35   :  { %1494 = dma.done.wait [#allocation8], 1536  }
  0x36   :  { %1495 = vsyncadd [#allocation8], 4294965760  ;;  %v1503_v0 = vmov 0.0|0.0   ;;  %vm1504_vm0 = vmmov 0   ;;  %v1505_v1 = vmov 0.0   ;;  %v58_v2 = vld [vmem:[#allocation7] sm:$0xff] }
  0x37   :  { %1269 = vmatprep.subr.bf16.mxu0 %v1503_v0  ;;  %1173 = vmatprep.mubr.msk.f32.mxu0 %vm1504_vm0, %v1505_v1  ;;  %v59_v3 = vld [vmem:[#allocation7 + $0x8] sm:$0xff]  ;;  %v60_v4 = vld [vmem:[#allocation7 + $0x10] sm:$0xff]  ;;  %v61_v6 = vld [vmem:[#allocation7 + $0x18] sm:$0xff]  ;;  %vm73_vm1 = vcmask 523264   ;;  %s1506_s26 = smov 32   ;;  %vm256_vm2 = vcmask 253952  }
  0x38   :  { %1281 = vmatprep.subr.bf16.mxu1 %v1503_v0  ;;  %1184 = vmatprep.mubr.msk.f32.mxu1 %vm1504_vm0, %v1505_v1  ;;  %v1270_v5 = vpack.c.bf16 %v59_v3, %v58_v2  ;;  %v1273_v7 = vpack.c.bf16 %v61_v6, %v60_v4  ;;  %v148_v8 = vld [vmem:[#allocation9] sm:$0xff]  ;;  %v149_v9 = vld [vmem:[#allocation9 + $0x8] sm:$0xff]  ;;  %v150_v10 = vld [vmem:[#allocation9 + $0x10] sm:$0xff]  ;;  %vm153_vm3 = vcmask 261120   ;;  %vm988_vm6 = vcmask 64512   ;;  %s1508_s27 = smov [#allocation10]  }
  0x39   :  { %v62_v11 = vld [vmem:[#allocation7 + $0x20] sm:$0xff]  ;;  %v63_v12 = vld [vmem:[#allocation7 + $0x28] sm:$0xff]  ;;  %v1583_v13 = vpack.c.bf16 %v149_v9, %v148_v8  ;;  %v151_v14 = vld [vmem:[#allocation9 + $0x18] sm:$0xff]  ;;  %s1076_s28 = sshll.u32 %s1508_s27, 4  ;;  %s1077_s28 = int_to_ptr.vmem [resolvable:$true] %s1076_s28 }
  0x3a   :  { %1271 = vmatpush3.bf16.msra.mxu0 %v1270_v5  ;;  %v1586_v15 = vpack.c.bf16 %v151_v14, %v150_v10  ;;  %v1276_v16 = vpack.c.bf16 %v63_v12, %v62_v11  ;;  %v64_v17 = vld [vmem:[#allocation7 + $0x30] sm:$0xff]  ;;  %v65_v18 = vld [vmem:[#allocation7 + $0x38] sm:$0xff]  ;;  %v1086_v23 = vld [vmem:[%s1706_s3] ss:$0 sm:$0xff]  ;;  %s1507_s3 = smov 64   ;;  %s1470_s29 = scalar_lea.vmem %s1077_s28, 128 }
  0x3b   :  { %1272 = vmatprep.subr.bf16.mxu0 %v1503_v0  ;;  %1283 = vmatpush3.bf16.msra.mxu1 %v1583_v13  ;;  %v1279_v19 = vpack.c.bf16 %v65_v18, %v64_v17  ;;  %v57_v20 = vld [vmem:[#allocation4] sm:$0xff]  ;;  %p1471_p10 = scmp.ne.s32.totalorder %s1077_s28, %s1470_s29  ;;  %p1475_p11 = scmp.lt.s32.totalorder %s1077_s28, %s1077_s28 }
  0x3c   :  { %1284 = vmatprep.subr.bf16.mxu1 %v1503_v0  ;;  %p1476_p12 = scmp.lt.s32.totalorder %s1470_s29, %s1470_s29 }
  0x3e   :  { %1274 = vmatpush3.bf16.msra.mxu0 %v1273_v7  ;;  %p1477_p13 = por %p1476_p12, %p1475_p11 }
  0x3f   :  { %1275 = vmatprep.subr.bf16.mxu0 %v1503_v0  ;;  %1286 = vmatpush3.bf16.msra.mxu1 %v1586_v15 }
  0x40   :  { %1287 = vmatprep.subr.bf16.mxu1 %v1503_v0  ;;  %p1478_p0 = pnand %p1477_p13, %p1471_p10 }
  0x42   :  { %1277 = vmatpush3.bf16.msra.mxu0 %v1276_v16  ;;  %1185 = vmatmul.mubr.f32.vlgmr.msra.gmra.mrb[0].mxu1 %v1505_v1 }
  0x43   :  { %1278 = vmatprep.subr.bf16.mxu0 %v1503_v0  ;;  %1289 = vmatpush3.bf16.msra.mxu1 %v1583_v13 }
  0x44   :  { %1195 = vmatprep.mubr.msk.f32.mxu1 %vm1504_vm0, %v1505_v1  ;;  %1290 = vmatprep.subr.bf16.mxu1 %v1503_v0 }
  0x46   :  { %1280 = vmatpush3.bf16.msra.mxu0 %v1279_v19 }
  0x47   :  { %1293 = vmatprep.subr.bf16.mxu0 %v1503_v0  ;;  %1292 = vmatpush3.bf16.msra.mxu1 %v1586_v15 }
  0x48   :  { %1299 = vmatprep.subr.bf16.mxu1 %v1503_v0 }
  0x49   :  { %1174 = vmatmul.mubr.msk.f32.vlgmr.msra.gmra.mrb[0].mxu0 %vm73_vm1, %v57_v20 }
  0x4a   :  { %1295 = vmatpush3.bf16.msra.mxu0 %v1583_v13  ;;  %1206 = vmatprep.mubr.msk.f32.mxu0 %vm1504_vm0, %v1505_v1 }
  0x4b   :  { %1296 = vmatprep.subr.bf16.mxu0 %v1503_v0 }
  0x4e   :  { %1298 = vmatpush3.bf16.msra.mxu0 %v1586_v15 }
  0x4f   :  { %1305 = vmatprep.subr.bf16.mxu0 %v1503_v0 }
 0x115   :  { %v223_v21 = vpop.f32.mrb[0].mxu1 }
 0x116   :  { %v1186_v22 = vpop.f32.mrb[1].mxu1 }
 0x11c   :  { %v143_v24 = vpop.f32.mrb[0].mxu0 }
 0x11d   :  { %v144_v25 = vadd.f32 %v1086_v23, %v143_v24  ;;  %v1175_v26 = vpop.f32.mrb[1].mxu0 }
 0x11f   :  { %147 = vst [vmem:[#allocation2] sm:$0xff] %v144_v25 }
 0x126   :  { %v152_v27 = vld [vmem:[#allocation2] sm:$0x1]  ;;  %v258_v43 = vld [vmem:[#allocation2 + $0x1] sm:$0x1]  ;;  %v361_v61 = vld [vmem:[#allocation2 + $0x2] sm:$0x1] }
 0x127   :  { %v227_v28 = vadd.f32 %v223_v21, %v152_v27  ;;  %v464_v19 = vld [vmem:[#allocation2 + $0x3] sm:$0x1] }
 0x129   :  { %1340 = vtanh.f32 %v227_v28  ;;  %v1088_v30 = vmul.f32 -1.442695, %v227_v28 }
 0x12b   :  { %1342 = vpow2.f32 %v1088_v30 }
 0x133   :  { %v1341_v29 = vpop.eup %1340 }
 0x134   :  { %237 = vrot.lane.b32.xlu0 %v1341_v29, %s1506_s26 }
 0x135   :  { %v1343_v31 = vpop.eup %1342 }
 0x136   :  { %v231_v32 = vadd.f32 1.0, %v1343_v31 }
 0x138   :  { %1344 = vrcp.f32 %v231_v32 }
 0x142   :  { %v1345_v33 = vpop.eup %1344 }
 0x143   :  { %v235_v36 = vmul.f32 0.0, %v1345_v33 }
 0x1a6   :  { %v238_v34 = vpop.permute.xlu0 %237 }
 0x1a7   :  { %v240_v35 = vmul.f32 %v1345_v33, %v238_v34 }
 0x1a9   :  { %242 = vrot.lane.b32.xlu0 %v240_v35, %s1506_s26 }
 0x21b   :  { %v243_v37 = vpop.permute.xlu0 %242 }
 0x21c   :  { %v245_v38 = vadd.f32 %v243_v37, %v235_v36  ;;  %v567_v37 = vld [vmem:[#allocation2 + $0x4] sm:$0x1] }
 0x21e   :  { %1346 = vtanh.f32 %v245_v38 }
 0x228   :  { %v1347_v39 = vpop.eup %1346 }
 0x229   :  { %248 = vrot.lane.b32.xlu1 %v1347_v39, %s1506_s26 }
 0x29b   :  { %v249_v40 = vpop.permute.xlu1 %248 }
 0x29c   :  { %v251_v41 = vmul.f32 %v1345_v33, %v249_v40 }
 0x29e   :  { %253 = vrot.lane.b32.xlu1 %v251_v41, %s1507_s3 }
 0x310   :  { %v254_v42 = vpop.permute.xlu1 %253 }
 0x311   :  { %257 = vst.msk [vmem:[#allocation3] sm:$0x1] %vm256_vm2, %v254_v42  ;;  %1196 = vmatmul.mubr.msk.f32.vlgmr.msra.gmra.mrb[2].mxu1 %vm153_vm3, %v254_v42 }
 0x312   :  { %1301 = vmatpush3.bf16.msra.mxu1 %v1583_v13  ;;  %1217 = vmatprep.mubr.msk.f32.mxu1 %vm1504_vm0, %v1505_v1 }
 0x313   :  { %1302 = vmatprep.subr.bf16.mxu1 %v1503_v0 }
 0x316   :  { %1304 = vmatpush3.bf16.msra.mxu1 %v1586_v15 }
 0x317   :  { %1311 = vmatprep.subr.bf16.mxu1 %v1503_v0 }
 0x3e4   :  { %v327_v44 = vpop.f32.mrb[2].mxu1 }
 0x3e5   :  { %v331_v45 = vadd.f32 %v327_v44, %v258_v43  ;;  %v1197_v46 = vpop.f32.mrb[3].mxu1 }
 0x3e7   :  { %1348 = vtanh.f32 %v331_v45  ;;  %v1090_v48 = vmul.f32 -1.442695, %v331_v45 }
 0x3e9   :  { %1350 = vpow2.f32 %v1090_v48 }
 0x3f1   :  { %v1349_v47 = vpop.eup %1348 }
 0x3f2   :  { %341 = vrot.lane.b32.xlu0 %v1349_v47, %s1506_s26 }
 0x3f3   :  { %v1351_v49 = vpop.eup %1350 }
 0x3f4   :  { %v335_v50 = vadd.f32 1.0, %v1351_v49 }
 0x3f6   :  { %1352 = vrcp.f32 %v335_v50 }
 0x400   :  { %v1353_v51 = vpop.eup %1352 }
 0x401   :  { %v339_v54 = vmul.f32 %v1353_v51, %v245_v38 }
 0x464   :  { %v342_v52 = vpop.permute.xlu0 %341 }
 0x465   :  { %v344_v53 = vmul.f32 %v1353_v51, %v342_v52 }
 0x467   :  { %346 = vrot.lane.b32.xlu1 %v344_v53, %s1506_s26 }
 0x4d9   :  { %v347_v55 = vpop.permute.xlu1 %346 }
 0x4da   :  { %v349_v56 = vadd.f32 %v347_v55, %v339_v54  ;;  %v670_v55 = vld [vmem:[#allocation2 + $0x5] sm:$0x1] }
 0x4dc   :  { %1354 = vtanh.f32 %v349_v56 }
 0x4e6   :  { %v1355_v57 = vpop.eup %1354 }
 0x4e7   :  { %352 = vrot.lane.b32.xlu0 %v1355_v57, %s1506_s26 }
 0x559   :  { %v353_v58 = vpop.permute.xlu0 %352 }
 0x55a   :  { %v355_v59 = vmul.f32 %v1353_v51, %v353_v58 }
 0x55c   :  { %357 = vrot.lane.b32.xlu1 %v355_v59, %s1507_s3 }
 0x5ce   :  { %v358_v60 = vpop.permute.xlu1 %357 }
 0x5cf   :  { %360 = vst.msk [vmem:[#allocation3 + $0x1] sm:$0x1] %vm256_vm2, %v358_v60  ;;  %1207 = vmatmul.mubr.msk.f32.vlgmr.msra.gmra.mrb[2].mxu0 %vm153_vm3, %v358_v60 }
 0x5d0   :  { %1307 = vmatpush3.bf16.msra.mxu0 %v1583_v13  ;;  %1228 = vmatprep.mubr.msk.f32.mxu0 %vm1504_vm0, %v1505_v1 }
 0x5d1   :  { %1308 = vmatprep.subr.bf16.mxu0 %v1503_v0 }
 0x5d4   :  { %1310 = vmatpush3.bf16.msra.mxu0 %v1586_v15 }
 0x5d5   :  { %1317 = vmatprep.subr.bf16.mxu0 %v1503_v0 }
 0x6a2   :  { %v430_v62 = vpop.f32.mrb[2].mxu0 }
 0x6a3   :  { %v434_v63 = vadd.f32 %v430_v62, %v361_v61  ;;  %v1208_v2 = vpop.f32.mrb[3].mxu0 }
 0x6a5   :  { %1356 = vtanh.f32 %v434_v63  ;;  %v1092_v4 = vmul.f32 -1.442695, %v434_v63 }
 0x6a7   :  { %1358 = vpow2.f32 %v1092_v4 }
 0x6af   :  { %v1357_v3 = vpop.eup %1356 }
 0x6b0   :  { %444 = vrot.lane.b32.xlu0 %v1357_v3, %s1506_s26 }
 0x6b1   :  { %v1359_v5 = vpop.eup %1358 }
 0x6b2   :  { %v438_v6 = vadd.f32 1.0, %v1359_v5 }
 0x6b4   :  { %1360 = vrcp.f32 %v438_v6 }
 0x6be   :  { %v1361_v7 = vpop.eup %1360 }
 0x6bf   :  { %v442_v10 = vmul.f32 %v1361_v7, %v349_v56 }
 0x722   :  { %v445_v8 = vpop.permute.xlu0 %444 }
 0x723   :  { %v447_v9 = vmul.f32 %v1361_v7, %v445_v8  ;;  %v773_v8 = vld [vmem:[#allocation2 + $0x6] sm:$0x1] }
 0x725   :  { %449 = vrot.lane.b32.xlu1 %v447_v9, %s1506_s26 }
 0x797   :  { %v450_v11 = vpop.permute.xlu1 %449 }
 0x798   :  { %v452_v12 = vadd.f32 %v450_v11, %v442_v10 }
 0x79a   :  { %1362 = vtanh.f32 %v452_v12 }
 0x7a4   :  { %v1363_v14 = vpop.eup %1362 }
 0x7a5   :  { %455 = vrot.lane.b32.xlu0 %v1363_v14, %s1506_s26 }
 0x817   :  { %v456_v16 = vpop.permute.xlu0 %455 }
 0x818   :  { %v458_v17 = vmul.f32 %v1361_v7, %v456_v16 }
 0x81a   :  { %460 = vrot.lane.b32.xlu1 %v458_v17, %s1507_s3 }
 0x88c   :  { %v461_v18 = vpop.permute.xlu1 %460 }
 0x88d   :  { %463 = vst.msk [vmem:[#allocation3 + $0x2] sm:$0x1] %vm256_vm2, %v461_v18  ;;  %1218 = vmatmul.mubr.msk.f32.vlgmr.msra.gmra.mrb[4].mxu1 %vm153_vm3, %v461_v18 }
 0x88e   :  { %1313 = vmatpush3.bf16.msra.mxu1 %v1583_v13  ;;  %1239 = vmatprep.mubr.msk.f32.mxu1 %vm1504_vm0, %v1505_v1 }
 0x88f   :  { %1314 = vmatprep.subr.bf16.mxu1 %v1503_v0 }
 0x892   :  { %1316 = vmatpush3.bf16.msra.mxu1 %v1586_v15 }
 0x893   :  { %1323 = vmatprep.subr.bf16.mxu1 %v1503_v0 }
 0x960   :  { %v533_v20 = vpop.f32.mrb[4].mxu1 }
 0x961   :  { %v537_v21 = vadd.f32 %v533_v20, %v464_v19  ;;  %v1219_v22 = vpop.f32.mrb[5].mxu1 }
 0x963   :  { %1364 = vtanh.f32 %v537_v21  ;;  %v1094_v24 = vmul.f32 -1.442695, %v537_v21 }
 0x965   :  { %1366 = vpow2.f32 %v1094_v24 }
 0x96d   :  { %v1365_v23 = vpop.eup %1364 }
 0x96e   :  { %547 = vrot.lane.b32.xlu0 %v1365_v23, %s1506_s26 }
 0x96f   :  { %v1367_v25 = vpop.eup %1366 }
 0x970   :  { %v541_v26 = vadd.f32 1.0, %v1367_v25 }
 0x972   :  { %1368 = vrcp.f32 %v541_v26 }
 0x97c   :  { %v1369_v27 = vpop.eup %1368 }
 0x97d   :  { %v545_v30 = vmul.f32 %v1369_v27, %v452_v12 }
 0x9e0   :  { %v548_v28 = vpop.permute.xlu0 %547 }
 0x9e1   :  { %v550_v29 = vmul.f32 %v1369_v27, %v548_v28  ;;  %v876_v28 = vld [vmem:[#allocation2 + $0x7] sm:$0x1] }
 0x9e3   :  { %552 = vrot.lane.b32.xlu1 %v550_v29, %s1506_s26 }
 0xa55   :  { %v553_v31 = vpop.permute.xlu1 %552 }
 0xa56   :  { %v555_v32 = vadd.f32 %v553_v31, %v545_v30 }
 0xa58   :  { %1370 = vtanh.f32 %v555_v32 }
 0xa62   :  { %v1371_v33 = vpop.eup %1370 }
 0xa63   :  { %558 = vrot.lane.b32.xlu0 %v1371_v33, %s1506_s26 }
 0xad5   :  { %v559_v34 = vpop.permute.xlu0 %558 }
 0xad6   :  { %v561_v35 = vmul.f32 %v1369_v27, %v559_v34 }
 0xad8   :  { %563 = vrot.lane.b32.xlu1 %v561_v35, %s1507_s3 }
 0xb4a   :  { %v564_v36 = vpop.permute.xlu1 %563 }
 0xb4b   :  { %566 = vst.msk [vmem:[#allocation3 + $0x3] sm:$0x1] %vm256_vm2, %v564_v36  ;;  %1229 = vmatmul.mubr.msk.f32.vlgmr.msra.gmra.mrb[4].mxu0 %vm153_vm3, %v564_v36 }
 0xb4c   :  { %1319 = vmatpush3.bf16.msra.mxu0 %v1583_v13  ;;  %1250 = vmatprep.mubr.msk.f32.mxu0 %vm1504_vm0, %v1505_v1 }
 0xb4d   :  { %1320 = vmatprep.subr.bf16.mxu0 %v1503_v0 }
 0xb50   :  { %1322 = vmatpush3.bf16.msra.mxu0 %v1586_v15 }
 0xb51   :  { %1264 = vmatprep.subr.mxu0 %v1505_v1 }
 0xc1e   :  { %v636_v38 = vpop.f32.mrb[4].mxu0 }
 0xc1f   :  { %v640_v39 = vadd.f32 %v636_v38, %v567_v37  ;;  %v1230_v40 = vpop.f32.mrb[5].mxu0 }
 0xc21   :  { %1372 = vtanh.f32 %v640_v39  ;;  %v1096_v42 = vmul.f32 -1.442695, %v640_v39 }
 0xc23   :  { %1374 = vpow2.f32 %v1096_v42 }
 0xc2b   :  { %v1373_v41 = vpop.eup %1372 }
 0xc2c   :  { %650 = vrot.lane.b32.xlu0 %v1373_v41, %s1506_s26 }
 0xc2d   :  { %v1375_v43 = vpop.eup %1374 }
 0xc2e   :  { %v644_v44 = vadd.f32 1.0, %v1375_v43 }
 0xc30   :  { %1376 = vrcp.f32 %v644_v44 }
 0xc3a   :  { %v1377_v45 = vpop.eup %1376 }
 0xc3b   :  { %v648_v48 = vmul.f32 %v1377_v45, %v555_v32 }
 0xc9e   :  { %v651_v46 = vpop.permute.xlu0 %650 }
 0xc9f   :  { %v653_v47 = vmul.f32 %v1377_v45, %v651_v46 }
 0xca1   :  { %655 = vrot.lane.b32.xlu1 %v653_v47, %s1506_s26 }
 0xd13   :  { %v656_v49 = vpop.permute.xlu1 %655 }
 0xd14   :  { %v658_v50 = vadd.f32 %v656_v49, %v648_v48 }
 0xd16   :  { %1378 = vtanh.f32 %v658_v50 }
 0xd20   :  { %v1379_v51 = vpop.eup %1378 }
 0xd21   :  { %661 = vrot.lane.b32.xlu0 %v1379_v51, %s1506_s26 }
 0xd93   :  { %v662_v52 = vpop.permute.xlu0 %661 }
 0xd94   :  { %v664_v53 = vmul.f32 %v1377_v45, %v662_v52  ;;  %v980_v45 = vlaneseq }
 0xd96   :  { %666 = vrot.lane.b32.xlu1 %v664_v53, %s1507_s3  ;;  %v981_v46 = vshrl.u32 %v980_v45, 7  ;;  %v983_v47 = vand.u32 127, %v980_v45 }
 0xd98   :  { %v984_v49 = vadd.s32 %v983_v47, %v981_v46  ;;  %vm1062_vm4 = vcmp.lt.s32.totalorder %v983_v47, 16 }
 0xd9a   :  { %vm985_vm5 = vcmp.eq.s32.totalorder %v984_v49, 7 }
 0xd9b   :  { %v1103_v51 = vsel %vm985_vm5, 1.0, %v1505_v1 }
 0xe08   :  { %v667_v54 = vpop.permute.xlu1 %666 }
 0xe09   :  { %669 = vst.msk [vmem:[#allocation3 + $0x4] sm:$0x1] %vm256_vm2, %v667_v54  ;;  %1240 = vmatmul.mubr.msk.f32.vlgmr.msra.gmra.mrb[6].mxu1 %vm153_vm3, %v667_v54 }
 0xe0a   :  { %1325 = vmatpush3.bf16.msra.mxu1 %v1583_v13  ;;  %1261 = vmatprep.mubr.msk.f32.mxu1 %vm1504_vm0, %v1505_v1 }
 0xe0b   :  { %1326 = vmatprep.subr.bf16.mxu1 %v1503_v0 }
 0xe0e   :  { %1328 = vmatpush3.bf16.msra.mxu1 %v1586_v15 }
 0xedc   :  { %v739_v56 = vpop.f32.mrb[6].mxu1 }
 0xedd   :  { %v743_v57 = vadd.f32 %v739_v56, %v670_v55  ;;  %v1241_v58 = vpop.f32.mrb[7].mxu1 }
 0xedf   :  { %1380 = vtanh.f32 %v743_v57  ;;  %v1098_v60 = vmul.f32 -1.442695, %v743_v57 }
 0xee1   :  { %1382 = vpow2.f32 %v1098_v60 }
 0xee9   :  { %v1381_v59 = vpop.eup %1380 }
 0xeea   :  { %753 = vrot.lane.b32.xlu0 %v1381_v59, %s1506_s26 }
 0xeeb   :  { %v1383_v61 = vpop.eup %1382 }
 0xeec   :  { %v747_v62 = vadd.f32 1.0, %v1383_v61 }
 0xeee   :  { %1384 = vrcp.f32 %v747_v62 }
 0xef8   :  { %v1385_v13 = vpop.eup %1384 }
 0xef9   :  { %v751_v0 = vmul.f32 %v1385_v13, %v658_v50  ;;  %v1105_v50 = vsel %vm1062_vm4, 1.0, %v1505_v1 }
 0xefa   :  { %v1066_v54 = vsub.f32 1.0, %v1105_v50 }
 0xf5c   :  { %v754_v63 = vpop.permute.xlu0 %753 }
 0xf5d   :  { %v756_v2 = vmul.f32 %v1385_v13, %v754_v63 }
 0xf5f   :  { %758 = vrot.lane.b32.xlu1 %v756_v2, %s1506_s26 }
 0xfd1   :  { %v759_v15 = vpop.permute.xlu1 %758 }
 0xfd2   :  { %v761_v3 = vadd.f32 %v759_v15, %v751_v0 }
 0xfd4   :  { %1386 = vtanh.f32 %v761_v3 }
 0xfde   :  { %v1387_v4 = vpop.eup %1386 }
 0xfdf   :  { %764 = vrot.lane.b32.xlu0 %v1387_v4, %s1506_s26 }
0x1051   :  { %v765_v5 = vpop.permute.xlu0 %764 }
0x1052   :  { %v767_v6 = vmul.f32 %v1385_v13, %v765_v5 }
0x1054   :  { %769 = vrot.lane.b32.xlu1 %v767_v6, %s1507_s3 }
0x10c6   :  { %v770_v7 = vpop.permute.xlu1 %769 }
0x10c7   :  { %772 = vst.msk [vmem:[#allocation3 + $0x5] sm:$0x1] %vm256_vm2, %v770_v7  ;;  %1251 = vmatmul.mubr.msk.f32.vlgmr.msra.gmra.mrb[6].mxu0 %vm153_vm3, %v770_v7 }
0x10c8   :  { %1266 = vmatprep.mubr.msk.f32.mxu0 %vm1504_vm0, %v1505_v1 }
0x119a   :  { %v842_v9 = vpop.f32.mrb[6].mxu0 }
0x119b   :  { %v846_v10 = vadd.f32 %v842_v9, %v773_v8  ;;  %v1252_v11 = vpop.f32.mrb[7].mxu0 }
0x119d   :  { %1388 = vtanh.f32 %v846_v10  ;;  %v1100_v14 = vmul.f32 -1.442695, %v846_v10 }
0x119f   :  { %1390 = vpow2.f32 %v1100_v14 }
0x11a7   :  { %v1389_v12 = vpop.eup %1388 }
0x11a8   :  { %856 = vrot.lane.b32.xlu0 %v1389_v12, %s1506_s26 }
0x11a9   :  { %v1391_v16 = vpop.eup %1390 }
0x11aa   :  { %v850_v17 = vadd.f32 1.0, %v1391_v16 }
0x11ac   :  { %1392 = vrcp.f32 %v850_v17 }
0x11b6   :  { %v1393_v18 = vpop.eup %1392 }
0x11b7   :  { %v854_v21 = vmul.f32 %v1393_v18, %v761_v3 }
0x121a   :  { %v857_v19 = vpop.permute.xlu0 %856 }
0x121b   :  { %v859_v20 = vmul.f32 %v1393_v18, %v857_v19 }
0x121d   :  { %861 = vrot.lane.b32.xlu1 %v859_v20, %s1506_s26 }
0x128f   :  { %v862_v22 = vpop.permute.xlu1 %861 }
0x1290   :  { %v864_v23 = vadd.f32 %v862_v22, %v854_v21 }
0x1292   :  { %1394 = vtanh.f32 %v864_v23 }
0x129c   :  { %v1395_v24 = vpop.eup %1394 }
0x129d   :  { %867 = vrot.lane.b32.xlu0 %v1395_v24, %s1506_s26 }
0x130f   :  { %v868_v25 = vpop.permute.xlu0 %867 }
0x1310   :  { %v870_v26 = vmul.f32 %v1393_v18, %v868_v25 }
0x1312   :  { %872 = vrot.lane.b32.xlu1 %v870_v26, %s1507_s3 }
0x1384   :  { %v873_v27 = vpop.permute.xlu1 %872 }
0x1385   :  { %875 = vst.msk [vmem:[#allocation3 + $0x6] sm:$0x1] %vm256_vm2, %v873_v27  ;;  %1262 = vmatmul.mubr.msk.f32.vlgmr.msra.gmra.mrb[8].mxu1 %vm153_vm3, %v873_v27 }
0x1458   :  { %v945_v29 = vpop.f32.mrb[8].mxu1 }
0x1459   :  { %v949_v30 = vadd.f32 %v945_v29, %v876_v28  ;;  %v1263_v31 = vpop.f32.mrb[9].mxu1 }
0x145b   :  { %1396 = vtanh.f32 %v949_v30  ;;  %v1102_v33 = vmul.f32 -1.442695, %v949_v30 }
0x145d   :  { %1398 = vpow2.f32 %v1102_v33 }
0x1465   :  { %v1397_v32 = vpop.eup %1396 }
0x1466   :  { %959 = vrot.lane.b32.xlu0 %v1397_v32, %s1506_s26 }
0x1467   :  { %v1399_v34 = vpop.eup %1398 }
0x1468   :  { %v953_v35 = vadd.f32 1.0, %v1399_v34 }
0x146a   :  { %1400 = vrcp.f32 %v953_v35 }
0x1474   :  { %v1401_v36 = vpop.eup %1400 }
0x1475   :  { %v957_v39 = vmul.f32 %v1401_v36, %v864_v23 }
0x14d8   :  { %v960_v37 = vpop.permute.xlu0 %959 }
0x14d9   :  { %v962_v38 = vmul.f32 %v1401_v36, %v960_v37 }
0x14db   :  { %964 = vrot.lane.b32.xlu1 %v962_v38, %s1506_s26 }
0x154d   :  { %v965_v40 = vpop.permute.xlu1 %964 }
0x154e   :  { %v967_v41 = vadd.f32 %v965_v40, %v957_v39 }
0x1550   :  { %1402 = vtanh.f32 %v967_v41 }
0x155a   :  { %v1403_v42 = vpop.eup %1402 }
0x155b   :  { %970 = vrot.lane.b32.xlu0 %v1403_v42, %s1506_s26 }
0x15cd   :  { %v971_v43 = vpop.permute.xlu0 %970 }
0x15ce   :  { %v973_v44 = vmul.f32 %v1401_v36, %v971_v43 }
0x15d0   :  { %975 = vrot.lane.b32.xlu1 %v973_v44, %s1507_s3 }
0x1642   :  { %v976_v48 = vpop.permute.xlu1 %975 }
0x1643   :  { %978 = vst.msk [vmem:[#allocation3 + $0x7] sm:$0x1] %vm256_vm2, %v976_v48 }
0x164a   :  { %v979_v52 = vld [vmem:[#allocation3] sm:$0xff] }
0x164b   :  { %1265 = vmatpush3.msra.mxu0 %v979_v52  ;;  %v1065_v53 = vmul.f32 %v1105_v50, %v979_v52 }
0x164c   :  { %1267 = vmatmul.mubr.msk.f32.vlgmr.msra.gmra.mrb[8].mxu0 %vm988_vm6, %v1103_v51 }
0x171f   :  { %v1058_v55 = vpop.f32.mrb[8].mxu0 }
0x1720   :  { %v1067_v56 = vmul.f32 %v1066_v54, %v1058_v55  ;;  %v1268_v57 = vpop.f32.mrb[9].mxu0 }
0x1722   :  { %v1068_v58 = vadd.f32 %v1067_v56, %v1065_v53 }
0x1724   :  { %1069 = vst.msk [vmem:[#allocation10] sm:$0xff] %vm153_vm3, %v1068_v58 }
0x1725   :  { %1481 = shalt.err (!%p1478_p0)
}
0x1726   :  { %s1482_s6 = scalar_lea.hbm %s1707_s4, 128 }
0x1727   :  { %p1483_p1 = scmp.ne.s32.totalorder %s1707_s4, %s1482_s6  ;;  %p1486_p2 = scmp.lt.u32.totalorder %s1482_s6, %s1707_s4 }
0x1729   :  { %p1488_p3 = pnand %p1486_p2, %p1483_p1 }
0x172b   :  { %1491 = shalt.err (!%p1488_p3)
}
0x172c   :  { %1079 = dma.vmem_to_hbm [thread:$0]  %s1077_s28, 128, %s1707_s4, [#allocation6]  }
0x172d   :  { %1496 = dma.done.wait [#allocation6], 128  }
0x172e   :  { %1497 = vsyncadd [#allocation6], 4294967168 }
0x172f   :  { %1083 = vsyncpa [#allocation5], 1 }
0x1730   :  { %1084 = vsyncpa [#allocation8], 1 }
0x1731   :  { %1085 = vsyncpa [#allocation6], 1 }

</bundles_post_ra>
